<compile_context>
chip_gen: v5e
topology: v5e:2x2
jax: 0.10.0
libtpu: 0.0.40
codegen_flags: <defaults>
</compile_context>

<pallas_src>
import functools

import jax
import jax.numpy as jnp
from jax.experimental import pallas as pl
from jax.experimental.pallas import tpu as pltpu


def _round_up(x, m):
    return (x + m - 1) // m * m


def _vmem_budget_bytes():
    """~75% of this chip's physical VMEM, with a conservative fallback."""
    try:
        cap = int(getattr(pltpu.get_tpu_info(), "vmem_capacity_bytes", 64 << 20))
    except Exception:
        cap = 64 << 20          # safe for v7x (64 MiB) and anything larger
    return int(cap) * 3 // 4


def _pad2(a, rows, cols):
    if a.shape == (rows, cols):
        return a
    return jnp.pad(a, ((0, rows - a.shape[0]), (0, cols - a.shape[1])))


# --------------------------- proj_type == "linear" ---------------------------
def _matmul_bias_resident_kernel(x_ref, w_ref, b_ref, o_ref):
    # W is VMEM-resident (constant index_map); single K step -> no accumulator.
    acc = jnp.dot(x_ref[...].astype(jnp.bfloat16), w_ref[...],
                  preferred_element_type=jnp.float32)
    o_ref[...] = (acc + b_ref[...]).astype(o_ref.dtype)


def _matmul_bias_onek_kernel(x_ref, w_ref, b_ref, o_ref):
    # Streamed variant, single K step: write dot + bias directly, no scratch.
    acc = jnp.dot(x_ref[...], w_ref[...], preferred_element_type=jnp.float32)
    o_ref[...] = (acc + b_ref[...]).astype(o_ref.dtype)


def _matmul_bias_acc_kernel(x_ref, w_ref, b_ref, o_ref, acc_ref):
    k = pl.program_id(2)

    @pl.when(k == 0)
    def _():
        # Fold the bias into the accumulator init.
        acc_ref[...] = jnp.broadcast_to(b_ref[...], acc_ref.shape).astype(jnp.float32)

    acc_ref[...] += jnp.dot(x_ref[...], w_ref[...],
                            preferred_element_type=jnp.float32)

    @pl.when(k == pl.num_programs(2) - 1)
    def _():
        o_ref[...] = acc_ref[...].astype(o_ref.dtype)


def _matmul_bias(x2d, w, b, out_dtype, *, _force_streamed=False):
    """(M, K) @ (K, N) + b -- bf16 MXU operands, f32 accumulation."""
    M, K = x2d.shape
    _, N = w.shape
    budget = _vmem_budget_bytes()
    out_bytes = jnp.dtype(out_dtype).itemsize
    x_bytes = x2d.dtype.itemsize

    Kp, Np = _round_up(K, 128), _round_up(N, 128)
    tm = min(512, _round_up(M, 128))

    # VMEM estimate for the weight-resident variant (assume everything is
    # double-buffered by the pipeline, plus in-kernel f32/bf16 temporaries).
    resident_bytes = (2 * Kp * Np * 2            # W (bf16)
                      + 2 * Np * 4               # bias
                      + 2 * tm * Kp * x_bytes    # X blocks (native dtype)
                      + 2 * tm * Np * out_bytes  # output blocks
                      + tm * Np * 4              # f32 dot result
                      + tm * Kp * 2)             # bf16 cast of the X tile

    if resident_bytes <= budget and not _force_streamed:
        # ---- weight-resident: one streaming pass over X, grid over M only ----
        Mp = _round_up(M, tm)
        xp = _pad2(x2d, Mp, Kp)                          # cast to bf16 in-kernel
        wp = _pad2(w.astype(jnp.bfloat16), Kp, Np)
        bp = _pad2(b.astype(jnp.float32).reshape(1, N), 1, Np)
        out = pl.pallas_call(
            _matmul_bias_resident_kernel,
            out_shape=jax.ShapeDtypeStruct((Mp, Np), out_dtype),
            grid_spec=pltpu.PrefetchScalarGridSpec(
                num_scalar_prefetch=0,
                grid=(Mp // tm,),
                in_specs=[
                    pl.BlockSpec((tm, Kp), lambda i: (i, 0)),
                    pl.BlockSpec((Kp, Np), lambda i: (0, 0)),   # resident weight
                    pl.BlockSpec((1, Np), lambda i: (0, 0)),
                ],
                out_specs=pl.BlockSpec((tm, Np), lambda i: (i, 0)),
            ),
            compiler_params=pltpu.CompilerParams(
                dimension_semantics=("parallel",),
                vmem_limit_bytes=budget),
        )(xp, wp, bp)
    else:
        # ---- streamed fallback for very large weights: big tiles, K last ----
        tn = min(1024, _round_up(N, 128))
        tk = min(2048, _round_up(K, 128))
        Mp, Kp, Np = _round_up(M, tm), _round_up(K, tk), _round_up(N, tn)
        xp = _pad2(x2d.astype(jnp.bfloat16), Mp, Kp)     # X re-streamed -> bf16
        wp = _pad2(w.astype(jnp.bfloat16), Kp, Np)
        bp = _pad2(b.astype(jnp.float32).reshape(1, N), 1, Np)
        nk = Kp // tk
        kernel = _matmul_bias_onek_kernel if nk == 1 else _matmul_bias_acc_kernel
        scratch = [] if nk == 1 else [pltpu.VMEM((tm, tn), jnp.float32)]
        out = pl.pallas_call(
            kernel,
            out_shape=jax.ShapeDtypeStruct((Mp, Np), out_dtype),
            grid_spec=pltpu.PrefetchScalarGridSpec(
                num_scalar_prefetch=0,
                grid=(Mp // tm, Np // tn, nk),
                in_specs=[
                    pl.BlockSpec((tm, tk), lambda i, j, k: (i, k)),
                    pl.BlockSpec((tk, tn), lambda i, j, k: (k, j)),
                    pl.BlockSpec((1, tn), lambda i, j, k: (0, j)),
                ],
                out_specs=pl.BlockSpec((tm, tn), lambda i, j, k: (i, j)),
                scratch_shapes=scratch,
            ),
            compiler_params=pltpu.CompilerParams(
                dimension_semantics=("parallel", "parallel", "arbitrary"),
                vmem_limit_bytes=budget),
        )(xp, wp, bp)

    if (Mp, Np) == (M, N):
        return out
    return out[:M, :N]


def qkv_linear(x, w, b, out_dtype=None):
    # x: (B, L, C), w: (C, 3C), b: (3C,)
    B, L, C = x.shape
    C3 = w.shape[1]
    out_dtype = x.dtype if out_dtype is None else out_dtype
    y = _matmul_bias(x.reshape(B * L, C), w, b, out_dtype)
    return y.reshape(B, L, C3)


# ----------------------- proj_type == "separable_conv" -----------------------
def _sepconv_fused_kernel(x_hbm, wdw_ref, bdw_ref, wpw_ref, bpw_ref, o_ref,
                          xbuf, sem, *, th, W, use_act, batch_major):
    # Grid = (parallel axis, sequential axis); the sequential (innermost) axis
    # drives a manual 2-slot double buffer for the overlapping (th+2)-row input
    # strips, so the halo is never materialized in HBM.
    if batch_major:
        b = pl.program_id(0)      # image
        strip = pl.program_id(1)  # row strip (sequential)
        seq = strip
    else:
        strip = pl.program_id(0)  # row strip (parallel)
        b = pl.program_id(1)      # image (sequential)
        seq = b
    nseq = pl.num_programs(1)
    slot = seq % 2

    def src(s):
        if batch_major:
            return x_hbm.at[b, pl.ds(s * th, th + 2)]
        return x_hbm.at[s, pl.ds(strip * th, th + 2)]

    @pl.when(seq == 0)                       # prime at the start of each run
    def _():
        pltpu.make_async_copy(src(0), xbuf.at[0], sem.at[0]).start()

    @pl.when(seq + 1 < nseq)                 # prefetch next strip / image
    def _():
        pltpu.make_async_copy(src(seq + 1), xbuf.at[1 - slot],
                              sem.at[1 - slot]).start()

    pltpu.make_async_copy(src(seq), xbuf.at[slot], sem.at[slot]).wait()

    x = xbuf[slot].astype(jnp.float32)       # (th+2, W+2, Cp) -- cast once
    Cp = x.shape[-1]
    wdw = wdw_ref[...].astype(jnp.float32)   # (3, 3, Cp)

    # Depthwise 3x3: hoist the sublane-misaligned width (kx) shifts -- 3 slices
    # instead of 9; the row (leading-dim) shifts inside the loop are cheap.
    acc = jnp.zeros((th, W, Cp), jnp.float32)
    for kx in range(3):
        xs = x[:, kx:kx + W, :]              # (th+2, W, Cp)
        for ky in range(3):
            acc = acc + xs[ky:ky + th] * wdw[ky, kx]
    acc = acc + bdw_ref[...].astype(jnp.float32)

    if use_act:
        acc = jax.nn.gelu(acc, approximate=False)        # exact erf GELU (f32)

    # 1x1 pointwise conv == channel matmul (MXU): bf16 operands, f32 accumulate.
    y = acc.reshape(th * W, Cp).astype(jnp.bfloat16)
    out = jnp.dot(y, wpw_ref[...], preferred_element_type=jnp.float32)
    out = out + bpw_ref[...]
    o_ref[...] = out.astype(o_ref.dtype)


def _pick_th(H, W, Cp, C3p, budget, target_rows=2048):
    """Row-strip height: divides H, keeps th*W a multiple of 8, fits VMEM."""
    valid = [t for t in range(1, H + 1)
             if H % t == 0 and ((t * W) % 8 == 0 or t == H)]
    # Rough per-row VMEM: 2 input buffers + f32 copy + 3 shifted slices
    # + depthwise accumulator + f32 matmul result + 2 output buffers.
    per_row = (W + 2) * Cp * 4 * 6 + W * Cp * 4 + W * C3p * 4 * 3
    cap_rows = max(1, (budget // 2) // per_row)
    fit = [t for t in valid if t <= cap_rows] or valid[:1]
    for t in fit:
        if t * W >= target_rows:
            return t
    return fit[-1]


def qkv_separable_conv(x, x_size, w_dw, b_dw, w_pw, b_pw, *,
                       use_act=True, out_dtype=None, target_rows=2048):
    # x: (B, L, C) tokens (row-major over H, W), x_size = (H, W)
    # w_dw: (3, 3, C) depthwise, w_pw: (C, 3C) pointwise (channels-last weights)
    B, L, C = x.shape
    H, W = x_size
    assert L == H * W
    C3 = w_pw.shape[1]
    out_dtype = x.dtype if out_dtype is None else out_dtype
    Cp = _round_up(C, 128)
    C3p = _round_up(C3, 128)
    budget = _vmem_budget_bytes()
    th = _pick_th(H, W, Cp, C3p, budget, target_rows)
    nH = H // th

    # blc -> NHWC, one fused pad (spatial halo + lane-dense channels). The
    # overlapping row strips are NOT materialized: the kernel DMAs them
    # straight out of this padded array.
    x_nhwc = x.reshape(B, H, W, C)
    xp = jnp.pad(x_nhwc, ((0, 0), (1, 1), (1, 1), (0, Cp - C)))

    wdw_p = w_dw if Cp == C else jnp.pad(w_dw, ((0, 0), (0, 0), (0, Cp - C)))
    wdw_p = wdw_p.astype(jnp.float32)
    bdw_p = (b_dw if Cp == C else jnp.pad(b_dw, (0, Cp - C)))
    bdw_p = bdw_p.astype(jnp.float32).reshape(1, Cp)
    wpw_p = w_pw.astype(jnp.bfloat16)
    if (Cp, C3p) != (C, C3):
        wpw_p = jnp.pad(wpw_p, ((0, Cp - C), (0, C3p - C3)))
    bpw_p = (b_pw if C3p == C3 else jnp.pad(b_pw, (0, C3p - C3)))
    bpw_p = bpw_p.astype(jnp.float32).reshape(1, C3p)

    # Put the larger extent on the parallel (megacore) axis; the sequential
    # axis stays innermost so the manual prefetch/prime logic is valid.
    batch_major = B >= nH
    grid = (B, nH) if batch_major else (nH, B)
    if batch_major:
        out_map = lambda b, i: (b, i, 0)
    else:
        out_map = lambda i, b: (b, i, 0)

    kernel = functools.partial(_sepconv_fused_kernel, th=th, W=W,
                               use_act=use_act, batch_major=batch_major)
    out = pl.pallas_call(
        kernel,
        out_shape=jax.ShapeDtypeStruct((B, H * W, C3p), out_dtype),
        grid_spec=pltpu.PrefetchScalarGridSpec(
            num_scalar_prefetch=0,
            grid=grid,
            in_specs=[
                pl.BlockSpec(memory_space=pl.ANY),               # x stays in HBM
                pl.BlockSpec((3, 3, Cp), lambda a, b: (0, 0, 0)),
                pl.BlockSpec((1, Cp), lambda a, b: (0, 0)),
                pl.BlockSpec((Cp, C3p), lambda a, b: (0, 0)),
                pl.BlockSpec((1, C3p), lambda a, b: (0, 0)),
            ],
            out_specs=pl.BlockSpec((pl.Squeezed(), th * W, C3p), out_map),
            scratch_shapes=[
                pltpu.VMEM((2, th + 2, W + 2, Cp), x.dtype),
                pltpu.SemaphoreType.DMA((2,)),
            ],
        ),
        compiler_params=pltpu.CompilerParams(
            dimension_semantics=("parallel", "arbitrary"),
            vmem_limit_bytes=budget),
    )(xp, wdw_p, bdw_p, wpw_p, bpw_p)
    if C3p == C3:
        return out
    return out[:, :, :C3]                              # bchw_to_blc: (B, L, 3C)


# -------------------------------- references --------------------------------
def _ref_linear(x, w, b):
    return x @ w + b


def _ref_sepconv(x, x_size, w_dw, b_dw, w_pw, b_pw, use_act):
    B, L, C = x.shape
    H, W = x_size
    x_nhwc = x.reshape(B, H, W, C)
    y = jax.lax.conv_general_dilated(
        x_nhwc, w_dw.reshape(3, 3, 1, C),
        window_strides=(1, 1), padding=((1, 1), (1, 1)),
        dimension_numbers=("NHWC", "HWIO", "NHWC"),
        feature_group_count=C)
    y = y + b_dw
    if use_act:
        y = jax.nn.gelu(y, approximate=False)
    out = jnp.einsum("bhwc,cd->bhwd", y, w_pw) + b_pw
    return out.reshape(B, H * W, -1)


if __name__ == "__main__":
    B, H, W, dim = 2, 8, 8, 32
    L = H * W
    separable_conv_act = True   # args.separable_conv_act

    key = jax.random.PRNGKey(0)
    k_x, k_lw, k_lb, k_dw, k_db, k_pw, k_pb = jax.random.split(key, 7)

    x = jax.random.normal(k_x, (B, L, dim), jnp.float32)

    # linear body params: nn.Linear(dim, 3*dim) stored channels-last (dim, 3*dim)
    w_lin = jax.random.normal(k_lw, (dim, 3 * dim), jnp.float32) * 0.05
    b_lin = jax.random.normal(k_lb, (3 * dim,), jnp.float32) * 0.05

    # separable conv body params (channels-last equivalents of NCHW conv weights)
    w_dw = jax.random.normal(k_dw, (3, 3, dim), jnp.float32) * 0.1      # dw 3x3
    b_dw = jax.random.normal(k_db, (dim,), jnp.float32) * 0.05
    w_pw = jax.random.normal(k_pw, (dim, 3 * dim), jnp.float32) * 0.05  # 1x1 pw
    b_pw = jax.random.normal(k_pb, (3 * dim,), jnp.float32) * 0.05

    # proj_type == "linear": weight-resident path (bf16 MXU -> loose tolerance)
    out_lin = jax.block_until_ready(qkv_linear(x, w_lin, b_lin))
    ref_lin = _ref_linear(x, w_lin, b_lin)
    assert out_lin.shape == (B, L, 3 * dim)
    assert jnp.allclose(out_lin, ref_lin, rtol=2e-2, atol=2e-2), \
        float(jnp.max(jnp.abs(out_lin - ref_lin)))

    # linear: exercise the streamed fallback path too
    out_lin_s = jax.block_until_ready(
        _matmul_bias(x.reshape(B * L, dim), w_lin, b_lin, x.dtype,
                     _force_streamed=True)).reshape(B, L, 3 * dim)
    assert jnp.allclose(out_lin_s, ref_lin, rtol=2e-2, atol=2e-2), \
        float(jnp.max(jnp.abs(out_lin_s - ref_lin)))

    # proj_type == "separable_conv": single-strip (batch-major) case
    out_sep = jax.block_until_ready(
        qkv_separable_conv(x, (H, W), w_dw, b_dw, w_pw, b_pw,
                           use_act=separable_conv_act))
    ref_sep = _ref_sepconv(x, (H, W), w_dw, b_dw, w_pw, b_pw, separable_conv_act)
    assert out_sep.shape == (B, L, 3 * dim)
    assert jnp.allclose(out_sep, ref_sep, rtol=2e-2, atol=2e-2), \
        float(jnp.max(jnp.abs(out_sep - ref_sep)))

    # separable_conv: multi-strip, batch-major (exercises strip prefetch)
    H2, W2, B2 = 4, 8, 2
    x2 = jax.random.normal(k_x, (B2, H2 * W2, dim), jnp.float32)
    out_sep2 = jax.block_until_ready(
        qkv_separable_conv(x2, (H2, W2), w_dw, b_dw, w_pw, b_pw,
                           use_act=separable_conv_act, target_rows=16))
    ref_sep2 = _ref_sepconv(x2, (H2, W2), w_dw, b_dw, w_pw, b_pw,
                            separable_conv_act)
    assert jnp.allclose(out_sep2, ref_sep2, rtol=2e-2, atol=2e-2), \
        float(jnp.max(jnp.abs(out_sep2 - ref_sep2)))

    # separable_conv: strip-major grid (parallel over strips, sequential over B)
    H3, W3, B3 = 16, 8, 3
    x3 = jax.random.normal(k_lb, (B3, H3 * W3, dim), jnp.float32)
    out_sep3 = jax.block_until_ready(
        qkv_separable_conv(x3, (H3, W3), w_dw, b_dw, w_pw, b_pw,
                           use_act=separable_conv_act, target_rows=16))
    ref_sep3 = _ref_sepconv(x3, (H3, W3), w_dw, b_dw, w_pw, b_pw,
                            separable_conv_act)
    assert jnp.allclose(out_sep3, ref_sep3, rtol=2e-2, atol=2e-2), \
        float(jnp.max(jnp.abs(out_sep3 - ref_sep3)))

    print("KERNEL_OK")
</pallas_src>

<mosaic_0001>
module attributes {stable_mosaic.version = 11 : i64} {
  func.func @_matmul_bias_resident_kernel(%arg0: i32, %arg1: memref<128x128xf32, #tpu.memory_space<vmem>>, %arg2: memref<128x128xbf16, #tpu.memory_space<vmem>>, %arg3: memref<1x128xf32, #tpu.memory_space<vmem>>, %arg4: memref<128x128xf32, #tpu.memory_space<vmem>>) attributes {dimension_semantics = [#tpu.dimension_semantics<parallel>], iteration_bounds = array<i64: 1>, scalar_prefetch = 0 : i64, scratch_operands = 0 : i64, tpu.core_type = #tpu.core_type<tc>, window_params = [{transform_indices = @transform_0, window_bounds = array<i64: 128, 128>}, {pipeline_mode = #tpu.pipeline_mode<synchronous>, transform_indices = @transform_1, window_bounds = array<i64: 128, 128>}, {pipeline_mode = #tpu.pipeline_mode<synchronous>, transform_indices = @transform_2, window_bounds = array<i64: 1, 128>}, {transform_indices = @transform_3, window_bounds = array<i64: 128, 128>}]} {
    %c0 = arith.constant 0 : index
    %c0_0 = arith.constant 0 : index
    %0 = vector.load %arg1[%c0, %c0_0] : memref<128x128xf32, #tpu.memory_space<vmem>>, vector<128x128xf32>
    %1 = arith.truncf %0 : vector<128x128xf32> to vector<128x128xbf16>
    %c0_1 = arith.constant 0 : index
    %c0_2 = arith.constant 0 : index
    %2 = vector.load %arg2[%c0_1, %c0_2] : memref<128x128xbf16, #tpu.memory_space<vmem>>, vector<128x128xbf16>
    %cst = arith.constant dense<0.000000e+00> : vector<128x128xf32>
    %3 = tpu.matmul %1, %2, %cst {dimension_numbers = #tpu.dot_dimension_numbers<[1], [0], [0], [1], [0, 0, 1, 1], [], []>} : vector<128x128xbf16>, vector<128x128xbf16>, vector<128x128xf32> -> vector<128x128xf32>
    %c0_3 = arith.constant 0 : index
    %c0_4 = arith.constant 0 : index
    %4 = vector.load %arg3[%c0_3, %c0_4] : memref<1x128xf32, #tpu.memory_space<vmem>>, vector<1x128xf32>
    %5 = vector.broadcast %4 : vector<1x128xf32> to vector<128x128xf32>
    %6 = arith.addf %3, %5 : vector<128x128xf32>
    %c0_5 = arith.constant 0 : index
    %c0_6 = arith.constant 0 : index
    %7 = vector.load %arg4[%c0_5, %c0_6] : memref<128x128xf32, #tpu.memory_space<vmem>>, vector<128x128xf32>
    tpu.vector_store %arg4[%c0_5, %c0_6], %6 {strides = array<i32>} : memref<128x128xf32, #tpu.memory_space<vmem>>, vector<128x128xf32>,
    return
  }
  func.func @transform_0(%arg0: i32) -> (i32, i32) {
    %c0_i32 = arith.constant 0 : i32
    %c0_i32_0 = arith.constant 0 : i32
    return %arg0, %c0_i32 : i32, i32
  }
  func.func @transform_1(%arg0: i32) -> (i32, i32) {
    %c0_i32 = arith.constant 0 : i32
    %c0_i32_0 = arith.constant 0 : i32
    %c0_i32_1 = arith.constant 0 : i32
    return %c0_i32, %c0_i32_0 : i32, i32
  }
  func.func @transform_2(%arg0: i32) -> (i32, i32) {
    %c0_i32 = arith.constant 0 : i32
    %c0_i32_0 = arith.constant 0 : i32
    %c0_i32_1 = arith.constant 0 : i32
    return %c0_i32, %c0_i32_0 : i32, i32
  }
  func.func @transform_3(%arg0: i32) -> (i32, i32) {
    %c0_i32 = arith.constant 0 : i32
    %c0_i32_0 = arith.constant 0 : i32
    return %arg0, %c0_i32 : i32, i32
  }
}

</mosaic_0001>

<bundles_post_ra>
// kernel: tpu_custom_call.1
= control target key start
LH: loop header
LB: loop body
LE: loop exit
PB: predicated region body
PF: predicated region fallthrough
CT: control target
= control target key end

     0   :  { %8 = vsyncpa [#allocation3], 0  ;;  %s419_s0 = inlined_call_operand.hbm [shape: f32[128,128], index: 0, kind: input, shape index: {}]   ;;  %s420_s1 = inlined_call_operand.hbm [shape: bf16[128,128], index: 1, kind: input, shape index: {}]   ;;  %s421_s2 = inlined_call_operand.vmem [shape: f32[1,128], index: 2, kind: input, shape index: {}]   ;;  %s422_s3 = inlined_call_operand.hbm [shape: f32[128,128], index: 3, kind: output, shape index: {}]  }
   0x1   :  { %9 = vsyncpa [#allocation6], 0 }
   0x2   :  { %10 = vsyncpa [#allocation4], 0  ;;  %s15_s14 = sshll.u32 %s419_s0, 4  ;;  %s374_s15 = smov [#allocation2]   ;;  %s16_s14 = int_to_ptr.hbm [resolvable:$true] %s15_s14 }
   0x3   :  { %s17_s16 = sshll.u32 %s374_s15, 4  ;;  %s28_s19 = sshll.u32 %s420_s1, 4  ;;  %s18_s16 = int_to_ptr.vmem [resolvable:$true] %s17_s16  ;;  %s29_s19 = int_to_ptr.hbm [resolvable:$true] %s28_s19 }
   0x4   :  { %s375_s20 = smov 128   ;;  %s376_s21 = smov 8  }
   0x5   :  { %23 = dma.hbm_to_vmem [thread:$0]  %s16_s14, 2048, %s18_s16, [#allocation3], %s375_s20, %s375_s20, %s376_s21  }
   0x6   :  { %s377_s22 = smov [#allocation5]   ;;  %s378_s24 = smov 64  }
   0x7   :  { %s30_s23 = sshll.u32 %s377_s22, 4  ;;  %s379_s0 = smov 4   ;;  %s31_s23 = int_to_ptr.vmem [resolvable:$true] %s30_s23 }
   0x8   :  { %36 = dma.hbm_to_vmem [thread:$0]  %s29_s19, 1024, %s31_s23, [#allocation6], %s378_s24, %s378_s24, %s379_s0  }
   0x9   :  { %368 = dma.done.wait [#allocation3], 2048  }
   0xa   :  { %369 = vsyncadd [#allocation3], 4294965248 }
   0xb   :  { %370 = dma.done.wait [#allocation6], 1024  }
   0xc   :  { %371 = vsyncadd [#allocation6], 4294966272  ;;  %v263_v0 = vld [vmem:[#allocation5 + $0x38] sm:$0xff]  ;;  %v262_v1 = vld [vmem:[#allocation5 + $0x30] sm:$0xff]  ;;  %s210_s29 = sshll.u32 %s422_s3, 4  ;;  %s211_s29 = int_to_ptr.hbm [resolvable:$true] %s210_s29 }
   0xd   :  { %139 = vmatpush.bf16.msra.mxu0 %v263_v0  ;;  %264 = vmatpush.bf16.msra.mxu1 %v263_v0  ;;  %v261_v2 = vld [vmem:[#allocation5 + $0x28] sm:$0xff]  ;;  %v260_v3 = vld [vmem:[#allocation5 + $0x20] sm:$0xff]  ;;  %v259_v4 = vld [vmem:[#allocation5 + $0x18] sm:$0xff] }
   0xe   :  { %265 = vmatpush.bf16.msra.mxu2 %v263_v0  ;;  %266 = vmatpush.bf16.msra.mxu3 %v263_v0  ;;  %v258_v5 = vld [vmem:[#allocation5 + $0x10] sm:$0xff]  ;;  %v257_v6 = vld [vmem:[#allocation5 + $0x8] sm:$0xff]  ;;  %v256_v7 = vld [vmem:[#allocation5] sm:$0xff] }
   0xf   :  { %v47_v8 = vld [vmem:[#allocation2] sm:$0xff]  ;;  %v48_v9 = vld [vmem:[#allocation2 + $0x8] sm:$0xff]  ;;  %v49_v20 = vld [vmem:[#allocation2 + $0x10] sm:$0xff] }
  0x10   :  { %v51_v10 = vld [vmem:[#allocation2 + $0x20] sm:$0xff]  ;;  %v52_v11 = vld [vmem:[#allocation2 + $0x28] sm:$0xff]  ;;  %v63_v16 = vpack.c.bf16 %v48_v9, %v47_v8  ;;  %v50_v21 = vld [vmem:[#allocation2 + $0x18] sm:$0xff] }
  0x11   :  { %140 = vmatpush.bf16.msra.mxu0 %v262_v1  ;;  %267 = vmatpush.bf16.msra.mxu1 %v262_v1  ;;  %v55_v12 = vld [vmem:[#allocation2 + $0x40] sm:$0xff]  ;;  %v56_v13 = vld [vmem:[#allocation2 + $0x48] sm:$0xff]  ;;  %v65_v17 = vpack.c.bf16 %v52_v11, %v51_v10  ;;  %v53_v22 = vld [vmem:[#allocation2 + $0x30] sm:$0xff]  ;;  %v64_v28 = vpack.c.bf16 %v50_v21, %v49_v20 }
  0x12   :  { %268 = vmatpush.bf16.msra.mxu2 %v262_v1  ;;  %269 = vmatpush.bf16.msra.mxu3 %v262_v1  ;;  %v59_v14 = vld [vmem:[#allocation2 + $0x60] sm:$0xff]  ;;  %v60_v15 = vld [vmem:[#allocation2 + $0x68] sm:$0xff]  ;;  %v67_v18 = vpack.c.bf16 %v56_v13, %v55_v12  ;;  %v54_v23 = vld [vmem:[#allocation2 + $0x38] sm:$0xff] }
  0x13   :  { %v69_v19 = vpack.c.bf16 %v60_v15, %v59_v14  ;;  %v57_v24 = vld [vmem:[#allocation2 + $0x50] sm:$0xff]  ;;  %v58_v25 = vld [vmem:[#allocation2 + $0x58] sm:$0xff]  ;;  %v66_v29 = vpack.c.bf16 %v54_v23, %v53_v22  ;;  %v295_v32 = vld [vmem:[%s421_s2] ss:$0 sm:$0xff]  ;;  %s380_s2 = smov [#allocation7]  }
  0x14   :  { %v61_v26 = vld [vmem:[#allocation2 + $0x70] sm:$0xff]  ;;  %v62_v27 = vld [vmem:[#allocation2 + $0x78] sm:$0xff]  ;;  %v68_v30 = vpack.c.bf16 %v58_v25, %v57_v24  ;;  %s208_s26 = sshll.u32 %s380_s2, 4  ;;  %s209_s26 = int_to_ptr.vmem [resolvable:$true] %s208_s26 }
  0x15   :  { %141 = vmatpush.bf16.msra.mxu0 %v261_v2  ;;  %270 = vmatpush.bf16.msra.mxu1 %v261_v2  ;;  %v70_v31 = vpack.c.bf16 %v62_v27, %v61_v26 }
  0x16   :  { %271 = vmatpush.bf16.msra.mxu2 %v261_v2  ;;  %272 = vmatpush.bf16.msra.mxu3 %v261_v2 }
  0x19   :  { %142 = vmatpush.bf16.msra.mxu0 %v260_v3  ;;  %273 = vmatpush.bf16.msra.mxu1 %v260_v3 }
  0x1a   :  { %274 = vmatpush.bf16.msra.mxu2 %v260_v3  ;;  %275 = vmatpush.bf16.msra.mxu3 %v260_v3 }
  0x1d   :  { %143 = vmatpush.bf16.msra.mxu0 %v259_v4  ;;  %276 = vmatpush.bf16.msra.mxu1 %v259_v4 }
  0x1e   :  { %277 = vmatpush.bf16.msra.mxu2 %v259_v4  ;;  %278 = vmatpush.bf16.msra.mxu3 %v259_v4 }
  0x21   :  { %144 = vmatpush.bf16.msra.mxu0 %v258_v5  ;;  %279 = vmatpush.bf16.msra.mxu1 %v258_v5 }
  0x22   :  { %280 = vmatpush.bf16.msra.mxu2 %v258_v5  ;;  %281 = vmatpush.bf16.msra.mxu3 %v258_v5 }
  0x25   :  { %145 = vmatpush.bf16.msra.mxu0 %v257_v6  ;;  %282 = vmatpush.bf16.msra.mxu1 %v257_v6 }
  0x26   :  { %283 = vmatpush.bf16.msra.mxu2 %v257_v6  ;;  %284 = vmatpush.bf16.msra.mxu3 %v257_v6 }
  0x29   :  { %146 = vmatpush.bf16.msra.mxu0 %v256_v7  ;;  %285 = vmatpush.bf16.msra.mxu1 %v256_v7 }
  0x2a   :  { %286 = vmatpush.bf16.msra.mxu2 %v256_v7  ;;  %287 = vmatpush.bf16.msra.mxu3 %v256_v7 }
  0x2c   :  { %147 = vmatmul.bf16.vlgmr.msra.gmra.mxu0 %v63_v16  ;;  %157 = vmatmul.bf16.vlgmr.msra.gmra.mxu1 %v65_v17 }
  0x2d   :  { %167 = vmatmul.bf16.vlgmr.msra.gmra.mxu2 %v67_v18  ;;  %177 = vmatmul.bf16.vlgmr.msra.gmra.mxu3 %v69_v19 }
  0x3c   :  { %152 = vmatmul.bf16.gmra.mxu0 %v64_v28  ;;  %162 = vmatmul.bf16.gmra.mxu1 %v66_v29 }
  0x3d   :  { %172 = vmatmul.bf16.gmra.mxu2 %v68_v30  ;;  %182 = vmatmul.bf16.gmra.mxu3 %v70_v31 }
  0xa9   :  { %v148_v33 = vpop.f32.mrf.mxu0  ;;  %v158_v34 = vpop.f32.mrf.mxu1 }
  0xaa   :  { %v149_v35 = vadd.f32 %v295_v32, %v148_v33  ;;  %v159_v36 = vadd.f32 %v295_v32, %v158_v34 }
  0xac   :  { %188 = vst [vmem:[#allocation7] sm:$0xff] %v149_v35 }
  0xad   :  { %192 = vst [vmem:[#allocation7 + $0x20] sm:$0xff] %v159_v36 }
  0xb0   :  { %v168_v37 = vpop.f32.mrf.mxu2  ;;  %v178_v38 = vpop.f32.mrf.mxu3 }
  0xb1   :  { %v169_v39 = vadd.f32 %v295_v32, %v168_v37  ;;  %v179_v40 = vadd.f32 %v295_v32, %v178_v38  ;;  %v150_v41 = vpop.f32.mrf.mxu0  ;;  %v160_v42 = vpop.f32.mrf.mxu1 }
  0xb2   :  { %v151_v43 = vadd.f32 %v295_v32, %v150_v41  ;;  %v161_v44 = vadd.f32 %v295_v32, %v160_v42 }
  0xb3   :  { %196 = vst [vmem:[#allocation7 + $0x40] sm:$0xff] %v169_v39 }
  0xb4   :  { %200 = vst [vmem:[#allocation7 + $0x60] sm:$0xff] %v179_v40 }
  0xb5   :  { %189 = vst [vmem:[#allocation7 + $0x8] sm:$0xff] %v151_v43 }
  0xb6   :  { %193 = vst [vmem:[#allocation7 + $0x28] sm:$0xff] %v161_v44 }
  0xb8   :  { %v170_v45 = vpop.f32.mrf.mxu2  ;;  %v180_v46 = vpop.f32.mrf.mxu3 }
  0xb9   :  { %v171_v47 = vadd.f32 %v295_v32, %v170_v45  ;;  %v181_v48 = vadd.f32 %v295_v32, %v180_v46  ;;  %v153_v49 = vpop.f32.mrf.mxu0  ;;  %v163_v50 = vpop.f32.mrf.mxu1 }
  0xba   :  { %v154_v51 = vadd.f32 %v295_v32, %v153_v49  ;;  %v164_v52 = vadd.f32 %v295_v32, %v163_v50 }
  0xbb   :  { %197 = vst [vmem:[#allocation7 + $0x48] sm:$0xff] %v171_v47 }
  0xbc   :  { %201 = vst [vmem:[#allocation7 + $0x68] sm:$0xff] %v181_v48 }
  0xbd   :  { %190 = vst [vmem:[#allocation7 + $0x10] sm:$0xff] %v154_v51 }
  0xbe   :  { %194 = vst [vmem:[#allocation7 + $0x30] sm:$0xff] %v164_v52 }
  0xc0   :  { %v173_v53 = vpop.f32.mrf.mxu2  ;;  %v183_v54 = vpop.f32.mrf.mxu3 }
  0xc1   :  { %v174_v55 = vadd.f32 %v295_v32, %v173_v53  ;;  %v184_v56 = vadd.f32 %v295_v32, %v183_v54  ;;  %v155_v57 = vpop.f32.mrf.mxu0  ;;  %v165_v58 = vpop.f32.mrf.mxu1 }
  0xc2   :  { %v156_v59 = vadd.f32 %v295_v32, %v155_v57  ;;  %v166_v60 = vadd.f32 %v295_v32, %v165_v58 }
  0xc3   :  { %198 = vst [vmem:[#allocation7 + $0x50] sm:$0xff] %v174_v55 }
  0xc4   :  { %202 = vst [vmem:[#allocation7 + $0x70] sm:$0xff] %v184_v56 }
  0xc5   :  { %191 = vst [vmem:[#allocation7 + $0x18] sm:$0xff] %v156_v59 }
  0xc6   :  { %195 = vst [vmem:[#allocation7 + $0x38] sm:$0xff] %v166_v60 }
  0xc8   :  { %v175_v61 = vpop.f32.mrf.mxu2  ;;  %v185_v62 = vpop.f32.mrf.mxu3 }
  0xc9   :  { %v176_v63 = vadd.f32 %v295_v32, %v175_v61  ;;  %v186_v0 = vadd.f32 %v295_v32, %v185_v62 }
  0xcb   :  { %199 = vst [vmem:[#allocation7 + $0x58] sm:$0xff] %v176_v63 }
  0xcc   :  { %203 = vst [vmem:[#allocation7 + $0x78] sm:$0xff] %v186_v0 }
  0xcd   :  { %216 = dma.vmem_to_hbm [thread:$0]  %s209_s26, 2048, %s211_s29, [#allocation4], %s375_s20, %s375_s20, %s376_s21  }
  0xce   :  { %372 = dma.done.wait [#allocation4], 2048  }
  0xcf   :  { %373 = vsyncadd [#allocation4], 4294965248 }
  0xd0   :  { %221 = vsyncpa [#allocation3], 1 }
  0xd1   :  { %222 = vsyncpa [#allocation6], 1 }
  0xd2   :  { %223 = vsyncpa [#allocation4], 1 }

</bundles_post_ra>
